<compile_context>
chip_gen: v7x
topology: tpu7x:2x2x1
jax: 0.10.0
libtpu: 0.0.40
codegen_flags: <defaults>
</compile_context>

<pallas_src>
import jax
import jax.numpy as jnp
from jax.experimental import pallas as pl
from jax.experimental.pallas import tpu as pltpu

LANE = 128
SUBL = 8
TARGET_BLOCK_BYTES = 4 << 20          # ~4 MiB per input per grid step
VMEM_LIMIT_BYTES = 32 << 20           # safe on v5e/v6e (128 MiB phys) and v7x (64 MiB phys)


def _cdiv(a, b):
    return -(-a // b)


def _make_mse_sum_kernel(block_rows, n_inner, n_valid_rows, needs_mask, n_part):
    """Kernel: accumulate sum((x - t)^2) over the inner grid axis.

    Writes one (8,128) lane-dense partial per outer grid index; the wrapper
    does the final scalar reduce.
    """

    def accumulate(acc_ref, d):
        d2 = d * d
        # Tile-aligned reshape; reduce into n_part independent (8,128) partials
        # so the add chains run in parallel across the VALU slots.
        acc_ref[...] += jnp.sum(d2.reshape(-1, n_part, SUBL, LANE), axis=0)

    def kernel(x_ref, t_ref, out_ref, acc_ref):
        i = pl.program_id(1)

        @pl.when(i == 0)
        def _():
            acc_ref[...] = jnp.zeros_like(acc_ref)

        if needs_mask:
            o = pl.program_id(0)
            row0 = (o * n_inner + i) * block_rows
            block_end = row0 + block_rows

            # Interior block: no mask work at all (steady state, HBM-bound).
            @pl.when(block_end <= n_valid_rows)
            def _():
                d = x_ref[...].astype(jnp.float32) - t_ref[...].astype(jnp.float32)
                accumulate(acc_ref, d)

            # Tail block straddling the logical end: mask out garbage padding
            # rows before squaring.
            @pl.when(jnp.logical_and(row0 < n_valid_rows, block_end > n_valid_rows))
            def _():
                d = x_ref[...].astype(jnp.float32) - t_ref[...].astype(jnp.float32)
                rows = row0 + jax.lax.broadcasted_iota(jnp.int32, (block_rows, LANE), 0)
                accumulate(acc_ref, jnp.where(rows < n_valid_rows, d, 0.0))

            # Clamped duplicate blocks (row0 >= n_valid_rows): skip entirely.
        else:
            d = x_ref[...].astype(jnp.float32) - t_ref[...].astype(jnp.float32)
            accumulate(acc_ref, d)

        @pl.when(i == n_inner - 1)
        def _():
            # Fold the n_part partials with a handful of elementwise adds;
            # the cross-lane reduce happens in the wrapper on (n_outer,8,128).
            out_ref[...] = jnp.sum(acc_ref[...], axis=0).reshape(1, SUBL, LANE)

    return kernel


def _sum_sq_diff(x2d, t2d, max_block_bytes=TARGET_BLOCK_BYTES):
    """x2d, t2d: (R, 128) slabs with R % 8 == 0. Returns scalar sum((x - t)^2), f32."""
    R = x2d.shape[0]
    x_item = jnp.dtype(x2d.dtype).itemsize
    t_item = jnp.dtype(t2d.dtype).itemsize

    # Size blocks by bytes (so bf16 inputs get 2x the rows of f32).
    max_rows = max(SUBL, (max_block_bytes // (LANE * max(x_item, t_item))) // SUBL * SUBL)
    block_rows = min(max_rows, R)
    n_blocks = _cdiv(R, block_rows)

    # v7x TensorCore split only when there is enough work to pipeline per core.
    n_outer = 2 if n_blocks >= 4 else 1
    n_inner = _cdiv(n_blocks, n_outer)
    needs_mask = (R % block_rows != 0) or (n_outer * n_inner != n_blocks)

    # ILP factor for the per-block reduction.
    n_part = 1
    for p in (4, 2):
        if block_rows % (p * SUBL) == 0:
            n_part = p
            break

    def in_idx(o, i):
        b = o * n_inner + i
        if needs_mask:
            b = jnp.minimum(b, n_blocks - 1)   # never start a DMA fully out of bounds
        return (b, 0)

    kernel = _make_mse_sum_kernel(block_rows, n_inner, R, needs_mask, n_part)

    n_bytes = x2d.size * x_item + t2d.size * t_item + n_outer * SUBL * LANE * 4
    cost = pl.CostEstimate(flops=3 * x2d.size, transcendentals=0,
                           bytes_accessed=n_bytes)

    partials = pl.pallas_call(
        kernel,
        out_shape=jax.ShapeDtypeStruct((n_outer, SUBL, LANE), jnp.float32),
        grid_spec=pltpu.PrefetchScalarGridSpec(
            num_scalar_prefetch=0,
            grid=(n_outer, n_inner),
            in_specs=[
                pl.BlockSpec((block_rows, LANE), in_idx),
                pl.BlockSpec((block_rows, LANE), in_idx),
            ],
            out_specs=pl.BlockSpec((1, SUBL, LANE), lambda o, i: (o, 0, 0)),
            scratch_shapes=[pltpu.VMEM((n_part, SUBL, LANE), jnp.float32)],
        ),
        compiler_params=pltpu.CompilerParams(
            dimension_semantics=("parallel", "arbitrary"),
            vmem_limit_bytes=VMEM_LIMIT_BYTES,
        ),
        cost_estimate=cost,
    )(x2d, t2d)
    return jnp.sum(partials)


# ----- differentiable wrapper: closed-form backward d/dx = 2*(x - t)*g -----

@jax.custom_vjp
def _sum_sq_diff_vjp(x2d, t2d):
    return _sum_sq_diff(x2d, t2d)


def _ssd_fwd(x2d, t2d):
    return _sum_sq_diff(x2d, t2d), (x2d, t2d)


def _ssd_bwd(res, g):
    x2d, t2d = res
    d = x2d.astype(jnp.float32) - t2d.astype(jnp.float32)
    gx = (2.0 * g) * d
    return gx.astype(x2d.dtype), jnp.zeros_like(t2d)


_sum_sq_diff_vjp.defvjp(_ssd_fwd, _ssd_bwd)


def _to_slab(a):
    """Flatten to a lane-dense (R, 128) slab with R % 8 == 0, keeping native dtype.

    Zero-copy (pure reshape) when a.size % 1024 == 0 (typical conv feature maps).
    Ragged sizes get a single zero-pad; padded zeros match in x and t, so the
    squared-difference sum stays exact.
    """
    n = a.size
    flat = a.reshape(-1)
    pad = (-n) % (SUBL * LANE)
    if pad:
        flat = jnp.pad(flat, (0, pad))
    return flat.reshape(-1, LANE), n


class ContentLoss:
    """JAX/Pallas port of the PyTorch ContentLoss module."""

    def __init__(self, target):
        # target.detach() -> stop gradients / store the constant target.
        self.target = jax.lax.stop_gradient(target)
        # Cache the flattened target slab once (constant across forwards).
        self._t2d, _ = _to_slab(self.target)
        self.loss = None

    def forward(self, input):
        x2d, n = _to_slab(input)
        # TODO(synk): self.loss as mutable Python state mirrors the PyTorch module;
        # under jax.jit of a surrounding function prefer returning (input, loss).
        self.loss = _sum_sq_diff_vjp(x2d, self._t2d) / jnp.float32(n)
        return input                        # pass-through, like the PyTorch module

    __call__ = forward


if __name__ == "__main__":
    key = jax.random.PRNGKey(0)
    k1, k2, k3, k4, k5, k6, k7, k8 = jax.random.split(key, 8)

    # 1) Primary check: small NCHW feature map (size % 1024 == 0 -> zero-copy path).
    target = jax.random.normal(k1, (2, 4, 16, 16), dtype=jnp.float32)
    x = jax.random.normal(k2, (2, 4, 16, 16), dtype=jnp.float32)
    module = ContentLoss(target)
    out = jax.block_until_ready(module(x))
    loss = jax.block_until_ready(module.loss)
    ref_loss = jnp.mean((x - target) ** 2)
    assert out.shape == x.shape and out.dtype == x.dtype
    assert jnp.allclose(out, x)
    assert jnp.allclose(loss, ref_loss, rtol=1e-6, atol=1e-6), (loss, ref_loss)

    # 1b) Gradient through the loss (custom_vjp): d/dx mse = 2*(x - t)/n.
    def loss_fn(xx):
        x2d, n = _to_slab(xx)
        return _sum_sq_diff_vjp(x2d, module._t2d) / jnp.float32(n)

    g = jax.block_until_ready(jax.grad(loss_fn)(x))
    ref_g = 2.0 * (x - target) / x.size
    assert jnp.allclose(g, ref_g, rtol=1e-5, atol=1e-6)

    # 2) Ragged size (exercises the zero-pad fallback path).
    target2 = jax.random.normal(k3, (3, 5, 9, 7), dtype=jnp.float32)
    x2 = jax.random.normal(k4, (3, 5, 9, 7), dtype=jnp.float32)
    module2 = ContentLoss(target2)
    out2 = jax.block_until_ready(module2(x2))
    loss2 = jax.block_until_ready(module2.loss)
    ref_loss2 = jnp.mean((x2 - target2) ** 2)
    assert jnp.allclose(out2, x2)
    assert jnp.allclose(loss2, ref_loss2, rtol=1e-6, atol=1e-6), (loss2, ref_loss2)

    # 3) Multi-block / mask / TensorCore-split path, forced via a tiny block size
    #    (16 rows -> 5 blocks, 2x3 grid with one clamped duplicate + one tail mask).
    x3 = jax.random.normal(k5, (2, 3, 40, 40), dtype=jnp.float32)
    t3 = jax.random.normal(k6, (2, 3, 40, 40), dtype=jnp.float32)
    x3s, _ = _to_slab(x3)
    t3s, _ = _to_slab(t3)
    ssd3 = jax.block_until_ready(_sum_sq_diff(x3s, t3s, max_block_bytes=16 * LANE * 4))
    ref3 = jnp.sum((x3 - t3) ** 2)
    assert jnp.allclose(ssd3, ref3, rtol=1e-4, atol=1e-2), (ssd3, ref3)

    # 4) bf16 inputs (byte-based block sizing + in-vreg widening).
    xb = jax.random.normal(k7, (2, 4, 16, 16), dtype=jnp.float32).astype(jnp.bfloat16)
    tb = jax.random.normal(k8, (2, 4, 16, 16), dtype=jnp.float32).astype(jnp.bfloat16)
    mb = ContentLoss(tb)
    outb = jax.block_until_ready(mb(xb))
    lossb = jax.block_until_ready(mb.loss)
    refb = jnp.mean((xb.astype(jnp.float32) - tb.astype(jnp.float32)) ** 2)
    assert outb.dtype == jnp.bfloat16 and jnp.allclose(
        outb.astype(jnp.float32), xb.astype(jnp.float32))
    assert jnp.allclose(lossb, refb, rtol=1e-5, atol=1e-6), (lossb, refb)

    print("KERNEL_OK")
</pallas_src>

<mosaic_0001>
module attributes {stable_mosaic.version = 11 : i64} {
  func.func @kernel(%arg0: i32, %arg1: i32, %arg2: memref<16x128xf32, #tpu.memory_space<vmem>>, %arg3: memref<16x128xf32, #tpu.memory_space<vmem>>, %arg4: memref<1x8x128xf32, #tpu.memory_space<vmem>>, %arg5: memref<2x8x128xf32, #tpu.memory_space<vmem>>) attributes {dimension_semantics = [#tpu.dimension_semantics<parallel>, #tpu.dimension_semantics<arbitrary>], iteration_bounds = array<i64: 1, 1>, scalar_prefetch = 0 : i64, scratch_operands = 1 : i64, tpu.core_type = #tpu.core_type<tc>, window_params = [{transform_indices = @transform_0, window_bounds = array<i64: 16, 128>}, {transform_indices = @transform_1, window_bounds = array<i64: 16, 128>}, {transform_indices = @transform_2, window_bounds = array<i64: 1, 8, 128>}]} {
    %c0_i32 = arith.constant 0 : i32
    %0 = arith.cmpi eq, %arg1, %c0_i32 : i32
    %1 = arith.extui %0 : i1 to i32
    %c0_i32_0 = arith.constant 0 : i32
    %2 = arith.cmpi ne, %1, %c0_i32_0 : i32
    scf.if %2 {
      %cst_12 = arith.constant 0.000000e+00 : f32
      %15 = vector.broadcast %cst_12 : f32 to vector<2x8x128xf32>
      %c0_13 = arith.constant 0 : index
      %c0_14 = arith.constant 0 : index
      %c0_15 = arith.constant 0 : index
      %16 = vector.load %arg5[%c0_13, %c0_14, %c0_15] : memref<2x8x128xf32, #tpu.memory_space<vmem>>, vector<2x8x128xf32>
      tpu.vector_store %arg5[%c0_13, %c0_14, %c0_15], %15 {strides = array<i32>} : memref<2x8x128xf32, #tpu.memory_space<vmem>>, vector<2x8x128xf32>,
    } else {
    }
    %c0 = arith.constant 0 : index
    %c0_1 = arith.constant 0 : index
    %3 = vector.load %arg2[%c0, %c0_1] : memref<16x128xf32, #tpu.memory_space<vmem>>, vector<16x128xf32>
    %c0_2 = arith.constant 0 : index
    %c0_3 = arith.constant 0 : index
    %4 = vector.load %arg3[%c0_2, %c0_3] : memref<16x128xf32, #tpu.memory_space<vmem>>, vector<16x128xf32>
    %5 = arith.subf %3, %4 : vector<16x128xf32>
    %6 = arith.mulf %5, %5 : vector<16x128xf32>
    %c0_4 = arith.constant 0 : index
    %c0_5 = arith.constant 0 : index
    %c0_6 = arith.constant 0 : index
    %7 = vector.load %arg5[%c0_4, %c0_5, %c0_6] : memref<2x8x128xf32, #tpu.memory_space<vmem>>, vector<2x8x128xf32>
    %8 = vector.shape_cast %6 : vector<16x128xf32> to vector<1x2x8x128xf32>
    %cst = arith.constant dense<0.000000e+00> : vector<2x8x128xf32>
    %9 = vector.multi_reduction <add>, %8, %cst [0] : vector<1x2x8x128xf32> to vector<2x8x128xf32>
    %10 = arith.addf %7, %9 : vector<2x8x128xf32>
    %c0_7 = arith.constant 0 : index
    %c0_8 = arith.constant 0 : index
    %c0_9 = arith.constant 0 : index
    %11 = vector.load %arg5[%c0_7, %c0_8, %c0_9] : memref<2x8x128xf32, #tpu.memory_space<vmem>>, vector<2x8x128xf32>
    tpu.vector_store %arg5[%c0_7, %c0_8, %c0_9], %10 {strides = array<i32>} : memref<2x8x128xf32, #tpu.memory_space<vmem>>, vector<2x8x128xf32>,
    %c0_i32_10 = arith.constant 0 : i32
    %12 = arith.cmpi eq, %arg1, %c0_i32_10 : i32
    %13 = arith.extui %12 : i1 to i32
    %c0_i32_11 = arith.constant 0 : i32
    %14 = arith.cmpi ne, %13, %c0_i32_11 : i32
    scf.if %14 {
      %c0_12 = arith.constant 0 : index
      %c0_13 = arith.constant 0 : index
      %c0_14 = arith.constant 0 : index
      %15 = vector.load %arg5[%c0_12, %c0_13, %c0_14] : memref<2x8x128xf32, #tpu.memory_space<vmem>>, vector<2x8x128xf32>
      %cst_15 = arith.constant dense<0.000000e+00> : vector<8x128xf32>
      %16 = vector.multi_reduction <add>, %15, %cst_15 [0] : vector<2x8x128xf32> to vector<8x128xf32>
      %17 = vector.shape_cast %16 : vector<8x128xf32> to vector<1x8x128xf32>
      %c0_16 = arith.constant 0 : index
      %c0_17 = arith.constant 0 : index
      %c0_18 = arith.constant 0 : index
      %18 = vector.load %arg4[%c0_16, %c0_17, %c0_18] : memref<1x8x128xf32, #tpu.memory_space<vmem>>, vector<1x8x128xf32>
      tpu.vector_store %arg4[%c0_16, %c0_17, %c0_18], %17 {strides = array<i32>} : memref<1x8x128xf32, #tpu.memory_space<vmem>>, vector<1x8x128xf32>,
    } else {
    }
    return
  }
  func.func @transform_0(%arg0: i32, %arg1: i32) -> (i32, i32) {
    %c1_i32 = arith.constant 1 : i32
    %0 = arith.muli %arg0, %c1_i32 : i32
    %1 = arith.addi %0, %arg1 : i32
    %c0_i32 = arith.constant 0 : i32
    %c0_i32_0 = arith.constant 0 : i32
    return %1, %c0_i32 : i32, i32
  }
  func.func @transform_1(%arg0: i32, %arg1: i32) -> (i32, i32) {
    %c1_i32 = arith.constant 1 : i32
    %0 = arith.muli %arg0, %c1_i32 : i32
    %1 = arith.addi %0, %arg1 : i32
    %c0_i32 = arith.constant 0 : i32
    %c0_i32_0 = arith.constant 0 : i32
    return %1, %c0_i32 : i32, i32
  }
  func.func @transform_2(%arg0: i32, %arg1: i32) -> (i32, i32, i32) {
    %c0_i32 = arith.constant 0 : i32
    %c0_i32_0 = arith.constant 0 : i32
    %c0_i32_1 = arith.constant 0 : i32
    return %arg0, %c0_i32, %c0_i32_0 : i32, i32, i32
  }
}

</mosaic_0001>

<bundles_post_ra>
// kernel: tpu_custom_call.1
= control target key start
LH: loop header
LB: loop body
LE: loop exit
PB: predicated region body
PF: predicated region fallthrough
CT: control target
= control target key end

     0   :  { %7 = vsyncpa [#allocation4], 0  ;;  %s230_s0 = inlined_call_operand.hbm [shape: f32[16,128], index: 0, kind: input, shape index: {}]   ;;  %s231_s1 = inlined_call_operand.hbm [shape: f32[16,128], index: 1, kind: input, shape index: {}]   ;;  %s232_s2 = inlined_call_operand.hbm [shape: f32[1,8,128], index: 2, kind: output, shape index: {}]  }
   0x1   :  { %8 = vsyncpa [#allocation7], 0 }
   0x2   :  { %9 = vsyncpa [#allocation5], 0  ;;  %s174_s9 = smov [#allocation3]   ;;  %s102_s13 = scalar_lea.hbm %s230_s0, 256 }
   0x3   :  { %s19_s10 = sshll.u32 %s174_s9, 4  ;;  %p103_p0 = scmp.ne.s32.totalorder %s230_s0, %s102_s13  ;;  %s20_s10 = int_to_ptr.vmem [resolvable:$true] %s19_s10 }
   0x4   :  { %p106_p1 = scmp.lt.u32.totalorder %s102_s13, %s230_s0 }
   0x6   :  { %p108_p2 = pnand %p106_p1, %p103_p0 }
   0x8   :  { %111 = shalt.err (!%p108_p2)
}
   0x9   :  { %s112_s18 = scalar_lea.vmem %s20_s10, 256  ;;  %p117_p4 = scmp.lt.s32.totalorder %s20_s10, %s20_s10 }
   0xa   :  { %p113_p3 = scmp.ne.s32.totalorder %s20_s10, %s112_s18  ;;  %p118_p5 = scmp.lt.s32.totalorder %s112_s18, %s112_s18 }
   0xc   :  { %p119_p6 = por %p118_p5, %p117_p4 }
   0xe   :  { %p120_p7 = pnand %p119_p6, %p113_p3 }
  0x10   :  { %123 = shalt.err (!%p120_p7)
}
  0x11   :  { %s175_s19 = smov 128   ;;  %s176_s20 = smov 8  }
  0x12   :  { %25 = dma.hbm_to_vmem [thread:$0]  %s230_s0, 256, %s20_s10, [#allocation4], %s175_s19, %s175_s19, %s176_s20  }
  0x13   :  { %s177_s23 = smov [#allocation6]   ;;  %s124_s27 = scalar_lea.hbm %s231_s1, 256 }
  0x14   :  { %s35_s24 = sshll.u32 %s177_s23, 4  ;;  %p125_p8 = scmp.ne.s32.totalorder %s231_s1, %s124_s27  ;;  %s36_s24 = int_to_ptr.vmem [resolvable:$true] %s35_s24 }
  0x15   :  { %p128_p9 = scmp.lt.u32.totalorder %s124_s27, %s231_s1 }
  0x17   :  { %p130_p10 = pnand %p128_p9, %p125_p8 }
  0x19   :  { %133 = shalt.err (!%p130_p10)
}
  0x1a   :  { %s134_s4 = scalar_lea.vmem %s36_s24, 256  ;;  %p139_p12 = scmp.lt.s32.totalorder %s36_s24, %s36_s24 }
  0x1b   :  { %p135_p11 = scmp.ne.s32.totalorder %s36_s24, %s134_s4  ;;  %p140_p13 = scmp.lt.s32.totalorder %s134_s4, %s134_s4 }
  0x1d   :  { %p141_p0 = por %p140_p13, %p139_p12 }
  0x1f   :  { %p142_p1 = pnand %p141_p0, %p135_p11 }
  0x21   :  { %145 = shalt.err (!%p142_p1)
}
  0x22   :  { %41 = dma.hbm_to_vmem [thread:$0]  %s231_s1, 256, %s36_s24, [#allocation7], %s175_s19, %s175_s19, %s176_s20  }
  0x23   :  { %168 = dma.done.wait [#allocation4], 256  }
  0x24   :  { %169 = vsyncadd [#allocation4], 4294967040 }
  0x25   :  { %170 = dma.done.wait [#allocation7], 256  }
  0x26   :  { %171 = vsyncadd [#allocation7], 4294967040  ;;  %v58_v0 = vld [vmem:[#allocation3] sm:$0xff]  ;;  %v59_v1 = vld [vmem:[#allocation3 + $0x8] sm:$0xff]  ;;  %s178_s6 = smov [#allocation8]  }
  0x27   :  { %v60_v2 = vld [vmem:[#allocation6] sm:$0xff]  ;;  %v61_v3 = vld [vmem:[#allocation6 + $0x8] sm:$0xff]  ;;  %s87_s7 = sshll.u32 %s178_s6, 4  ;;  %s88_s7 = int_to_ptr.vmem [resolvable:$true] %s87_s7 }
  0x28   :  { %v62_v4 = vsub.f32 %v58_v0, %v60_v2  ;;  %v63_v5 = vsub.f32 %v59_v1, %v61_v3  ;;  %s146_s8 = scalar_lea.vmem %s88_s7, 128  ;;  %p151_p3 = scmp.lt.s32.totalorder %s88_s7, %s88_s7 }
  0x29   :  { %p147_p2 = scmp.ne.s32.totalorder %s88_s7, %s146_s8  ;;  %p152_p4 = scmp.lt.s32.totalorder %s146_s8, %s146_s8 }
  0x2a   :  { %v64_v6 = vmul.f32 %v62_v4, %v62_v4  ;;  %v65_v7 = vmul.f32 %v63_v5, %v63_v5 }
  0x2b   :  { %p153_p5 = por %p152_p4, %p151_p3 }
  0x2c   :  { %v79_v8 = vadd.f32 %v65_v7, %v64_v6 }
  0x2d   :  { %p154_p6 = pnand %p153_p5, %p147_p2 }
  0x2e   :  { %80 = vst [vmem:[#allocation8] sm:$0xff] %v79_v8 }
  0x2f   :  { %157 = shalt.err (!%p154_p6)
}
  0x30   :  { %s158_s10 = scalar_lea.hbm %s232_s2, 128 }
  0x31   :  { %p159_p7 = scmp.ne.s32.totalorder %s232_s2, %s158_s10  ;;  %p162_p8 = scmp.lt.u32.totalorder %s158_s10, %s232_s2 }
  0x33   :  { %p164_p9 = pnand %p162_p8, %p159_p7 }
  0x35   :  { %167 = shalt.err (!%p164_p9)
}
  0x36   :  { %90 = dma.vmem_to_hbm [thread:$0]  %s88_s7, 128, %s232_s2, [#allocation5]  }
  0x37   :  { %172 = dma.done.wait [#allocation5], 128  }
  0x38   :  { %173 = vsyncadd [#allocation5], 4294967168 }
  0x39   :  { %94 = vsyncpa [#allocation4], 1 }
  0x3a   :  { %95 = vsyncpa [#allocation7], 1 }
  0x3b   :  { %96 = vsyncpa [#allocation5], 1 }

</bundles_post_ra>
